<compile_context>
chip_gen: v6e
topology: v6e:2x2x1
jax: 0.10.0
libtpu: 0.0.40
codegen_flags: <defaults>
</compile_context>

<pallas_src>
import jax
import jax.numpy as jnp
from jax.experimental import pallas as pl
from jax.experimental.pallas import tpu as pltpu


def _round_up(x, m):
    return ((x + m - 1) // m) * m


# ----------------------------- Pallas kernel -------------------------------
def _linear_kernel(x_ref, w_ref, b_ref, o_ref):
    # x_ref: (tm, D) bf16   w_ref: (D, Ep) bf16   b_ref: (1, Ep) f32
    # o_ref: (tm, Ep) out_dtype
    acc = jnp.dot(x_ref[...], w_ref[...], preferred_element_type=jnp.float32)
    o_ref[...] = (acc + b_ref[...]).astype(o_ref.dtype)


def linear_pallas(x2d, w, b, *, tm=512, compute_dtype=jnp.bfloat16,
                  out_dtype=None, fuse_patchify=True):
    """y = x2d @ w + b.   x2d: (M, D), w: (D, E), b: (E,) or (1, E) -> (M, E)."""
    M, D = x2d.shape
    E = w.shape[-1]
    if out_dtype is None:
        out_dtype = x2d.dtype

    # MXU operands in bf16, f32 accumulation.  Casts are no-ops if the caller
    # already pre-cast (the module does, for the weight).
    xc = x2d if x2d.dtype == compute_dtype else x2d.astype(compute_dtype)
    wc = w if w.dtype == compute_dtype else w.astype(compute_dtype)
    b2d = b.reshape(1, E).astype(jnp.float32)

    # Keep the output last dim lane-dense (multiple of 128) so stores are
    # unmasked vst.  Real configs (E=768) take the no-pad path.
    Ep = E if E % 128 == 0 else _round_up(E, 128)
    if Ep != E:
        wc = jnp.pad(wc, ((0, 0), (0, Ep - E)))
        b2d = jnp.pad(b2d, ((0, 0), (0, Ep - E)))

    # Row tile: large enough to keep the DMA pipeline deep; rounded to a
    # multiple of 128 for small M.  No host-side padding of M — the ragged
    # last block is clipped/masked by Pallas (rows are independent; do not
    # add cross-row reductions here without revisiting this).
    tm = min(tm, _round_up(M, 128))
    grid = (pl.cdiv(M, tm),)

    bytes_accessed = (M * D * jnp.dtype(compute_dtype).itemsize      # activations in
                      + D * Ep * jnp.dtype(compute_dtype).itemsize   # weight in
                      + Ep * 4                                       # bias in
                      + M * Ep * jnp.dtype(out_dtype).itemsize)      # out

    out = pl.pallas_call(
        _linear_kernel,
        out_shape=jax.ShapeDtypeStruct((M, Ep), out_dtype),
        grid_spec=pltpu.PrefetchScalarGridSpec(
            num_scalar_prefetch=0,
            grid=grid,
            in_specs=[
                pl.BlockSpec((tm, D), lambda i: (i, 0)),
                pl.BlockSpec((D, Ep), lambda i: (0, 0)),   # weight: VMEM-resident
                pl.BlockSpec((1, Ep), lambda i: (0, 0)),   # bias:   VMEM-resident
            ],
            out_specs=pl.BlockSpec((tm, Ep), lambda i: (i, 0)),
        ),
        compiler_params=pltpu.CompilerParams(
            dimension_semantics=("parallel",),                       # v7x megacore
            allow_input_fusion=[bool(fuse_patchify), False, False],  # fuse patchify/cast
        ),
        cost_estimate=pl.CostEstimate(
            flops=2 * M * D * Ep,
            transcendentals=0,
            bytes_accessed=bytes_accessed,
        ),
    )(xc, wc, b2d)

    return out if Ep == E else out[:, :E]


# ----------------------------- module wrapper -------------------------------
def patchify_spectrogram_jax(x, patch_size):
    """keep_chans=True, square_patches=False:
       rearrange(x, 'b c f (t p) -> b (t c) (f p)')."""
    B, C, Fd, T = x.shape
    assert T % patch_size == 0, "Time bins must be divisible by the patch size"
    p = patch_size
    t = T // p
    x = x.reshape(B, C, Fd, t, p)                 # b c f t p
    x = jnp.transpose(x, (0, 3, 1, 2, 4))         # b t c f p
    return x.reshape(B, t * C, Fd * p)            # b (t c) (f p)


class PatchEmbedLinearPallas:
    # TODO(synk): square_patches=True variant not implemented (module default is False).
    def __init__(self, img_size=64, patch_size=8, in_chans=23, embed_dim=768,
                 square_patches=False, out_dtype=jnp.float32,
                 fuse_patchify=True, key=jax.random.PRNGKey(0)):
        assert not square_patches
        self.img_size = img_size
        self.patch_size = patch_size
        self.in_chans = in_chans
        self.embed_dim = embed_dim
        self.out_dtype = out_dtype          # set to jnp.bfloat16 to halve writeback bytes
        self.fuse_patchify = fuse_patchify
        self.num_patches = in_chans * (img_size // patch_size)
        in_features = img_size * patch_size
        kw, kb = jax.random.split(key)
        bound = 1.0 / (in_features ** 0.5)
        # stored already transposed: (in_features, embed_dim); f32 master copy
        self.weight = jax.random.uniform(
            kw, (in_features, embed_dim), jnp.float32, -bound, bound)
        self.bias = jax.random.uniform(
            kb, (embed_dim,), jnp.float32, -bound, bound)
        # pre-cast / pre-shape once so no per-call cast/reshape op is emitted
        self.weight_bf16 = self.weight.astype(jnp.bfloat16)
        self.bias2d = self.bias.reshape(1, embed_dim)

    def __call__(self, x):
        # x: (B, C, F, T) float32
        patches = patchify_spectrogram_jax(x, self.patch_size)   # (B, N, D)
        B, N, D = patches.shape
        out = linear_pallas(
            patches.reshape(B * N, D), self.weight_bf16, self.bias2d,
            out_dtype=self.out_dtype, fuse_patchify=self.fuse_patchify)
        return out.reshape(B, N, self.embed_dim)


# ----------------------------------- main -----------------------------------
if __name__ == "__main__":
    # small, shape-consistent config: img_size=16, patch_size=4, in_chans=4
    B, C, IMG, P, E = 2, 4, 16, 4, 32
    key = jax.random.PRNGKey(0)
    kx, kparams = jax.random.split(key)
    x = jax.random.normal(kx, (B, C, IMG, IMG), jnp.float32)

    mod = PatchEmbedLinearPallas(img_size=IMG, patch_size=P, in_chans=C,
                                 embed_dim=E, key=kparams)
    fwd = jax.jit(mod.__call__)
    out = jax.block_until_ready(fwd(x))

    # pure-JAX f32 reference; kernel uses bf16 MXU operands -> relaxed tolerance
    patches_ref = patchify_spectrogram_jax(x, P)
    ref = patches_ref @ mod.weight + mod.bias
    assert out.shape == (B, C * (IMG // P), E)
    assert out.dtype == jnp.float32
    max_err = float(jnp.max(jnp.abs(out - ref)))
    assert jnp.allclose(out, ref, atol=5e-2, rtol=5e-2), f"max err {max_err}"
    print("KERNEL_OK")
</pallas_src>

<mosaic_0001>
module attributes {stable_mosaic.version = 11 : i64} {
  func.func @_linear_kernel(%arg0: i32, %arg1: memref<128x64xbf16, #tpu.memory_space<vmem>>, %arg2: memref<64x128xbf16, #tpu.memory_space<vmem>>, %arg3: memref<1x128xf32, #tpu.memory_space<vmem>>, %arg4: memref<128x128xf32, #tpu.memory_space<vmem>>) attributes {dimension_semantics = [#tpu.dimension_semantics<parallel>], iteration_bounds = array<i64: 1>, scalar_prefetch = 0 : i64, scratch_operands = 0 : i64, tpu.core_type = #tpu.core_type<tc>, window_params = [{transform_indices = @transform_0, window_bounds = array<i64: 128, 64>}, {pipeline_mode = #tpu.pipeline_mode<synchronous>, transform_indices = @transform_1, window_bounds = array<i64: 64, 128>}, {pipeline_mode = #tpu.pipeline_mode<synchronous>, transform_indices = @transform_2, window_bounds = array<i64: 1, 128>}, {transform_indices = @transform_3, window_bounds = array<i64: 128, 128>}]} {
    %c0 = arith.constant 0 : index
    %c0_0 = arith.constant 0 : index
    %0 = vector.load %arg1[%c0, %c0_0] : memref<128x64xbf16, #tpu.memory_space<vmem>>, vector<128x64xbf16>
    %c0_1 = arith.constant 0 : index
    %c0_2 = arith.constant 0 : index
    %1 = vector.load %arg2[%c0_1, %c0_2] : memref<64x128xbf16, #tpu.memory_space<vmem>>, vector<64x128xbf16>
    %cst = arith.constant dense<0.000000e+00> : vector<128x128xf32>
    %2 = tpu.matmul %0, %1, %cst {dimension_numbers = #tpu.dot_dimension_numbers<[1], [0], [0], [1], [0, 0, 1, 1], [], []>} : vector<128x64xbf16>, vector<64x128xbf16>, vector<128x128xf32> -> vector<128x128xf32>
    %c0_3 = arith.constant 0 : index
    %c0_4 = arith.constant 0 : index
    %3 = vector.load %arg3[%c0_3, %c0_4] : memref<1x128xf32, #tpu.memory_space<vmem>>, vector<1x128xf32>
    %4 = vector.broadcast %3 : vector<1x128xf32> to vector<128x128xf32>
    %5 = arith.addf %2, %4 : vector<128x128xf32>
    %c0_5 = arith.constant 0 : index
    %c0_6 = arith.constant 0 : index
    %6 = vector.load %arg4[%c0_5, %c0_6] : memref<128x128xf32, #tpu.memory_space<vmem>>, vector<128x128xf32>
    tpu.vector_store %arg4[%c0_5, %c0_6], %5 {strides = array<i32>} : memref<128x128xf32, #tpu.memory_space<vmem>>, vector<128x128xf32>,
    return
  }
  func.func @transform_0(%arg0: i32) -> (i32, i32) {
    %c0_i32 = arith.constant 0 : i32
    %c0_i32_0 = arith.constant 0 : i32
    return %arg0, %c0_i32 : i32, i32
  }
  func.func @transform_1(%arg0: i32) -> (i32, i32) {
    %c0_i32 = arith.constant 0 : i32
    %c0_i32_0 = arith.constant 0 : i32
    %c0_i32_1 = arith.constant 0 : i32
    return %c0_i32, %c0_i32_0 : i32, i32
  }
  func.func @transform_2(%arg0: i32) -> (i32, i32) {
    %c0_i32 = arith.constant 0 : i32
    %c0_i32_0 = arith.constant 0 : i32
    %c0_i32_1 = arith.constant 0 : i32
    return %c0_i32, %c0_i32_0 : i32, i32
  }
  func.func @transform_3(%arg0: i32) -> (i32, i32) {
    %c0_i32 = arith.constant 0 : i32
    %c0_i32_0 = arith.constant 0 : i32
    return %arg0, %c0_i32 : i32, i32
  }
}

</mosaic_0001>

<bundles_post_ra>
// kernel: a_call__.1
= control target key start
LH: loop header
LB: loop body
LE: loop exit
PB: predicated region body
PF: predicated region fallthrough
CT: control target
= control target key end

     0   :  { %8 = vsyncpa [#allocation3], 0  ;;  %vm111_vm0 = vcmask 523264   ;;  %s440_s0 = inlined_call_operand.vmem [shape: bf16[32,64], index: 0, kind: input, shape index: {}]   ;;  %s441_s1 = inlined_call_operand.vmem [shape: bf16[64,128], index: 1, kind: input, shape index: {}]   ;;  %s442_s2 = inlined_call_operand.vmem [shape: f32[1,128], index: 2, kind: input, shape index: {}]   ;;  %s443_s3 = inlined_call_operand.hbm [shape: f32[32,128], index: 3, kind: output, shape index: {}]  }
   0x1   :  { %v333_v0 = vld [vmem:[%s441_s1 + $0x18] sm:$0xff]   ;;  %v334_v1 = vld [vmem:[%s441_s1 + $0x10] sm:$0xff]   ;;  %v335_v2 = vld [vmem:[%s441_s1 + $0x8] sm:$0xff]  }
   0x2   :  { %298 = vmatprep.subr.bf16.mxu0 %v333_v0  ;;  %322 = vmatprep.subr.bf16.mxu1 %v333_v0  ;;  %v337_v3 = vld [vmem:[%s440_s0] sm:$0xff]   ;;  %v339_v6 = vld [vmem:[%s440_s0 + $0x8] sm:$0xff]   ;;  %v341_v8 = vld [vmem:[%s440_s0 + $0x10] sm:$0xff]  }
   0x3   :  { %299 = vmatpush3.bf16.msra.mxu0 %v333_v0  ;;  %326 = vmatpush3.bf16.msra.mxu1 %v333_v0  ;;  %v338_v4 = vld [vmem:[%s440_s0 + $0x20] sm:$0xff]   ;;  %v340_v7 = vld [vmem:[%s440_s0 + $0x28] sm:$0xff]   ;;  %v342_v9 = vld [vmem:[%s440_s0 + $0x30] sm:$0xff]  }
   0x4   :  { %300 = vmatprep.subr.bf16.mxu0 %v334_v1  ;;  %323 = vmatprep.subr.bf16.mxu1 %v334_v1  ;;  %v336_v5 = vld [vmem:[%s441_s1] sm:$0xff]   ;;  %v343_v10 = vld [vmem:[%s440_s0 + $0x18] sm:$0xff]  }
   0x5   :  { %306 = vmatprep.mubr.msk.bf16.mxu0 %vm111_vm0, %v337_v3  ;;  %314 = vmatprep.mubr.msk.bf16.mxu1 %vm111_vm0, %v338_v4  ;;  %v344_v11 = vld [vmem:[%s440_s0 + $0x38] sm:$0xff]   ;;  %v265_v12 = vld [vmem:[%s442_s2] ss:$0 sm:$0xff] }
   0x7   :  { %301 = vmatpush3.bf16.msra.mxu0 %v334_v1  ;;  %327 = vmatpush3.bf16.msra.mxu1 %v334_v1 }
   0x8   :  { %302 = vmatprep.subr.bf16.mxu0 %v335_v2  ;;  %324 = vmatprep.subr.bf16.mxu1 %v335_v2 }
   0xb   :  { %303 = vmatpush3.bf16.msra.mxu0 %v335_v2  ;;  %328 = vmatpush3.bf16.msra.mxu1 %v335_v2 }
   0xc   :  { %304 = vmatprep.subr.bf16.mxu0 %v336_v5  ;;  %325 = vmatprep.subr.bf16.mxu1 %v336_v5 }
   0xf   :  { %305 = vmatpush3.bf16.msra.mxu0 %v336_v5  ;;  %329 = vmatpush3.bf16.msra.mxu1 %v336_v5 }
  0x12   :  { %307 = vmatmul.mubr.msk.bf16.vlgmr.msra.gmra.mxu0 %vm111_vm0, %v339_v6  ;;  %315 = vmatmul.mubr.msk.bf16.vlgmr.msra.gmra.mxu1 %vm111_vm0, %v340_v7 }
  0x13   :  { %310 = vmatprep.mubr.msk.bf16.mxu0 %vm111_vm0, %v341_v8  ;;  %318 = vmatprep.mubr.msk.bf16.mxu1 %vm111_vm0, %v342_v9 }
  0x1a   :  { %311 = vmatmul.mubr.msk.bf16.gmra.mxu0 %vm111_vm0, %v343_v10  ;;  %319 = vmatmul.mubr.msk.bf16.gmra.mxu1 %vm111_vm0, %v344_v11 }
  0xd2   :  { %v308_v13 = vpop.f32.mrf.mxu0  ;;  %v316_v14 = vpop.f32.mrf.mxu1 }
  0xd3   :  { %v179_v15 = vadd.f32 %v308_v13, %v265_v12  ;;  %v211_v16 = vadd.f32 %v316_v14, %v265_v12 }
  0xd4   :  { %v170_v17 = vpop.f32.mrf.mxu0  ;;  %v202_v18 = vpop.f32.mrf.mxu1 }
  0xd5   :  { %235 = vst [vmem:[#allocation2 + $0x10] sm:$0xff] %v179_v15  ;;  %243 = vst [vmem:[#allocation2 + $0x50] sm:$0xff] %v211_v16  ;;  %v171_v19 = vadd.f32 %v265_v12, %v170_v17  ;;  %v203_v20 = vadd.f32 %v265_v12, %v202_v18 }
  0xd6   :  { %v309_v21 = vpop.f32.mrf.mxu0  ;;  %v317_v22 = vpop.f32.mrf.mxu1 }
  0xd7   :  { %233 = vst [vmem:[#allocation2] sm:$0xff] %v171_v19  ;;  %241 = vst [vmem:[#allocation2 + $0x40] sm:$0xff] %v203_v20  ;;  %v182_v23 = vadd.f32 %v309_v21, %v265_v12  ;;  %v214_v24 = vadd.f32 %v317_v22, %v265_v12 }
  0xd8   :  { %v173_v25 = vpop.f32.mrf.mxu0  ;;  %v205_v26 = vpop.f32.mrf.mxu1 }
  0xd9   :  { %236 = vst [vmem:[#allocation2 + $0x18] sm:$0xff] %v182_v23  ;;  %244 = vst [vmem:[#allocation2 + $0x58] sm:$0xff] %v214_v24  ;;  %v174_v27 = vadd.f32 %v265_v12, %v173_v25  ;;  %v206_v28 = vadd.f32 %v265_v12, %v205_v26 }
  0xda   :  { %v312_v29 = vpop.f32.mrf.mxu0  ;;  %v320_v30 = vpop.f32.mrf.mxu1 }
  0xdb   :  { %234 = vst [vmem:[#allocation2 + $0x8] sm:$0xff] %v174_v27  ;;  %242 = vst [vmem:[#allocation2 + $0x48] sm:$0xff] %v206_v28  ;;  %v195_v31 = vadd.f32 %v312_v29, %v265_v12  ;;  %v227_v32 = vadd.f32 %v320_v30, %v265_v12 }
  0xdc   :  { %v186_v33 = vpop.f32.mrf.mxu0  ;;  %v218_v34 = vpop.f32.mrf.mxu1 }
  0xdd   :  { %239 = vst [vmem:[#allocation2 + $0x30] sm:$0xff] %v195_v31  ;;  %247 = vst [vmem:[#allocation2 + $0x70] sm:$0xff] %v227_v32  ;;  %v187_v35 = vadd.f32 %v265_v12, %v186_v33  ;;  %v219_v36 = vadd.f32 %v265_v12, %v218_v34 }
  0xde   :  { %v313_v37 = vpop.f32.mrf.mxu0  ;;  %v321_v38 = vpop.f32.mrf.mxu1 }
  0xdf   :  { %237 = vst [vmem:[#allocation2 + $0x20] sm:$0xff] %v187_v35  ;;  %245 = vst [vmem:[#allocation2 + $0x60] sm:$0xff] %v219_v36  ;;  %v198_v39 = vadd.f32 %v313_v37, %v265_v12  ;;  %v230_v40 = vadd.f32 %v321_v38, %v265_v12 }
  0xe0   :  { %v189_v41 = vpop.f32.mrf.mxu0  ;;  %v221_v42 = vpop.f32.mrf.mxu1 }
  0xe1   :  { %240 = vst [vmem:[#allocation2 + $0x38] sm:$0xff] %v198_v39  ;;  %248 = vst [vmem:[#allocation2 + $0x78] sm:$0xff] %v230_v40  ;;  %v190_v43 = vadd.f32 %v265_v12, %v189_v41  ;;  %v222_v44 = vadd.f32 %v265_v12, %v221_v42 }
  0xe3   :  { %238 = vst [vmem:[#allocation2 + $0x28] sm:$0xff] %v190_v43  ;;  %246 = vst [vmem:[#allocation2 + $0x68] sm:$0xff] %v222_v44 }
  0xe4   :  { %253 = vsyncadd [#allocation3], 1536  ;;  %s367_s0 = smov [#allocation2]  }
  0xe5   :  { %s254_s2 = sshll.u32 %s367_s0, 4  ;;  %s255_s2 = int_to_ptr.vmem [resolvable:$true] %s254_s2 }
  0xe6   :  { %s345_s10 = scalar_lea.vmem %s255_s2, 512  ;;  %s349_s11 = scalar_lea.vmem %s255_s2, 2048 }
  0xe7   :  { %p346_p0 = scmp.ne.s32.totalorder %s255_s2, %s345_s10  ;;  %p350_p1 = scmp.lt.s32.totalorder %s255_s2, %s255_s2 }
  0xe8   :  { %p351_p2 = scmp.lt.s32.totalorder %s349_s11, %s345_s10 }
  0xea   :  { %p352_p3 = por %p351_p2, %p350_p1 }
  0xec   :  { %p353_p4 = pnand %p352_p3, %p346_p0 }
  0xee   :  { %356 = shalt.err (!%p353_p4)
}
  0xef   :  { %s368_s12 = smov 128   ;;  %s369_s13 = smov 8  }
  0xf0   :  { %260 = dma.vmem_to_hbm [thread:$0]  %s255_s2, 512, %s443_s3, [#allocation3], %s368_s12, %s368_s12, %s369_s13  }
  0xf1   :  { %365 = dma.done.wait [#allocation3], 2048  }
  0xf2   :  { %366 = vsyncadd [#allocation3], 4294965248 }
  0xf3   :  { %264 = vsyncpa [#allocation3], 1 }

</bundles_post_ra>
